<compile_context>
chip_gen: v6e
topology: v6e:2x2x1
jax: 0.10.0
libtpu: 0.0.40
codegen_flags: <defaults>
</compile_context>

<pallas_src>
import math
import functools

import jax
import jax.numpy as jnp
from jax import lax
from jax.experimental import pallas as pl
from jax.experimental.pallas import tpu as pltpu


# dtype fed to the MXU (matmul inputs). Accumulation is always f32 via
# preferred_element_type; elementwise/softmax math stays in f32 (v5e-safe).
MXU_DTYPE = jnp.bfloat16


def _pick_tile(dim, target, align):
    """Largest tile t <= target with t % align == 0 and dim % t == 0.
    Falls back to the full dimension (always a legal BlockSpec block)."""
    if dim <= target:
        return dim
    t = (target // align) * align
    while t >= align:
        if dim % t == 0:
            return t
        t -= align
    return dim


# ----------------------------------------------------------------------------
# Kernel 1: tiled fused linear  y = x @ W^T + b   (the in-projection)
# ----------------------------------------------------------------------------
def _linear_kernel(x_ref, w_ref, b_ref, o_ref, acc_ref):
    k = pl.program_id(2)

    @pl.when(k == 0)
    def _init():
        acc_ref[...] = jnp.zeros_like(acc_ref)

    # Contraction on the last dim of both operands: the MXU consumes the
    # (E_out, E_in) weight tile in this orientation natively (no .T / vxpose).
    acc_ref[...] += lax.dot_general(
        x_ref[...].astype(MXU_DTYPE),
        w_ref[...].astype(MXU_DTYPE),
        dimension_numbers=(((1,), (1,)), ((), ())),
        preferred_element_type=jnp.float32)

    @pl.when(k == pl.num_programs(2) - 1)
    def _finalize():
        o_ref[...] = (acc_ref[...] + b_ref[...].astype(jnp.float32)
                      ).astype(o_ref.dtype)


def pallas_linear(x, w, b, *, tm=256, tn=256, tk=512, out_dtype=None):
    """x: (T, E_in), w: (E_out, E_in), b: (E_out,) -> (T, E_out)."""
    T, E_in = x.shape
    E_out = w.shape[0]
    out_dtype = x.dtype if out_dtype is None else out_dtype
    tm = _pick_tile(T, tm, 8)
    tn = _pick_tile(E_out, tn, 128)
    tk = _pick_tile(E_in, tk, 128)
    grid = (T // tm, E_out // tn, E_in // tk)
    return pl.pallas_call(
        _linear_kernel,
        out_shape=jax.ShapeDtypeStruct((T, E_out), out_dtype),
        grid=grid,
        in_specs=[
            pl.BlockSpec((tm, tk), lambda i, j, k: (i, k)),
            pl.BlockSpec((tn, tk), lambda i, j, k: (j, k)),
            pl.BlockSpec((1, tn), lambda i, j, k: (0, j)),
        ],
        out_specs=pl.BlockSpec((tm, tn), lambda i, j, k: (i, j)),
        scratch_shapes=[pltpu.VMEM((tm, tn), jnp.float32)],
        compiler_params=pltpu.CompilerParams(
            dimension_semantics=("parallel", "parallel", "arbitrary")),
    )(x, w, b.reshape(1, E_out))


# ----------------------------------------------------------------------------
# Kernel 2: per-batch attention + fused out-projection — all heads per grid
# step, head-averaged weights accumulated in-kernel, lane-dense stores.
# ----------------------------------------------------------------------------
def _attn_core(q, k, v, num_heads):
    """q: (L, E) (already scaled), k/v: (S, E).
    Returns (attn (L, E) f32, head-averaged softmax weights (L, S) f32)."""
    L, E = q.shape
    S = k.shape[0]
    H = num_heads
    Dh = E // H

    # TODO(synk): flash-style online-softmax tiling over S for very long
    # sequences; here the full (L, S) per batch stays in VMEM, which
    # need_weights=True requires to be materialized anyway.
    w_acc = jnp.zeros((L, S), jnp.float32)
    head_outs = []
    for h in range(H):  # static, unrolled: all heads inside one grid step
        sl = slice(h * Dh, (h + 1) * Dh)
        qh = q[:, sl].astype(MXU_DTYPE)
        kh = k[:, sl].astype(MXU_DTYPE)
        vh = v[:, sl].astype(MXU_DTYPE)

        s = lax.dot_general(qh, kh, (((1,), (1,)), ((), ())),
                            preferred_element_type=jnp.float32)      # (L, S)
        m = jnp.max(s, axis=-1, keepdims=True)
        e = jnp.exp(s - m)
        denom = jnp.sum(e, axis=-1, keepdims=True)
        p = e * pl.reciprocal(denom, approx=True)                    # softmax
        w_acc = w_acc + p

        head_outs.append(
            lax.dot_general(p.astype(MXU_DTYPE), vh,
                            (((1,), (0,)), ((), ())),
                            preferred_element_type=jnp.float32))     # (L, Dh)

    attn = jnp.concatenate(head_outs, axis=-1)                       # (L, E)
    return attn, w_acc * (1.0 / H)


def _project_and_store(attn, w_avg, wo_ref, bo_ref, o_ref, w_ref):
    """Fused out-projection: o = attn @ W_out^T + b_out, single lane-dense
    (L, E) store; only the head-averaged (L, S) weights reach HBM."""
    proj = lax.dot_general(
        attn.astype(MXU_DTYPE), wo_ref[...].astype(MXU_DTYPE),
        dimension_numbers=(((1,), (1,)), ((), ())),
        preferred_element_type=jnp.float32)                          # (L, E)
    o_ref[0] = (proj + bo_ref[...].astype(jnp.float32)).astype(o_ref.dtype)
    w_ref[0] = w_avg.astype(w_ref.dtype)


def _self_attn_kernel(qkv_ref, wo_ref, bo_ref, o_ref, w_ref,
                      *, num_heads, embed_dim):
    qkv = qkv_ref[0]                                  # (L, 3E), split in VMEM
    E = embed_dim
    attn, w_avg = _attn_core(qkv[:, :E], qkv[:, E:2 * E], qkv[:, 2 * E:],
                             num_heads)
    _project_and_store(attn, w_avg, wo_ref, bo_ref, o_ref, w_ref)


def pallas_self_attention(qkv, out_w, out_b, num_heads, out_dtype):
    """qkv: (N, L, 3E) packed projections (q already scaled);
    out_w: (E, E), out_b: (E,)."""
    N, L, E3 = qkv.shape
    E = E3 // 3
    kern = functools.partial(_self_attn_kernel, num_heads=num_heads,
                             embed_dim=E)
    return pl.pallas_call(
        kern,
        out_shape=(jax.ShapeDtypeStruct((N, L, E), out_dtype),
                   jax.ShapeDtypeStruct((N, L, L), out_dtype)),
        grid=(N,),
        in_specs=[
            pl.BlockSpec((1, L, E3), lambda n: (n, 0, 0)),
            pl.BlockSpec((E, E), lambda n: (0, 0)),     # resident out-proj W
            pl.BlockSpec((1, E), lambda n: (0, 0)),     # resident out-proj b
        ],
        out_specs=(pl.BlockSpec((1, L, E), lambda n: (n, 0, 0)),
                   pl.BlockSpec((1, L, L), lambda n: (n, 0, 0))),
        compiler_params=pltpu.CompilerParams(
            dimension_semantics=("parallel",)),
    )(qkv, out_w, out_b.reshape(1, E))


def _cross_attn_kernel(q_ref, k_ref, v_ref, wo_ref, bo_ref, o_ref, w_ref,
                       *, num_heads):
    attn, w_avg = _attn_core(q_ref[0], k_ref[0], v_ref[0], num_heads)
    _project_and_store(attn, w_avg, wo_ref, bo_ref, o_ref, w_ref)


def pallas_cross_attention(q, k, v, out_w, out_b, num_heads, out_dtype):
    """q: (N, L, E) (already scaled), k/v: (N, S, E)."""
    N, L, E = q.shape
    S = k.shape[1]
    kern = functools.partial(_cross_attn_kernel, num_heads=num_heads)
    return pl.pallas_call(
        kern,
        out_shape=(jax.ShapeDtypeStruct((N, L, E), out_dtype),
                   jax.ShapeDtypeStruct((N, L, S), out_dtype)),
        grid=(N,),
        in_specs=[
            pl.BlockSpec((1, L, E), lambda n: (n, 0, 0)),
            pl.BlockSpec((1, S, E), lambda n: (n, 0, 0)),
            pl.BlockSpec((1, S, E), lambda n: (n, 0, 0)),
            pl.BlockSpec((E, E), lambda n: (0, 0)),
            pl.BlockSpec((1, E), lambda n: (0, 0)),
        ],
        out_specs=(pl.BlockSpec((1, L, E), lambda n: (n, 0, 0)),
                   pl.BlockSpec((1, L, S), lambda n: (n, 0, 0))),
        compiler_params=pltpu.CompilerParams(
            dimension_semantics=("parallel",)),
    )(q, k, v, out_w, out_b.reshape(1, E))


# ----------------------------------------------------------------------------
# MultiheadAttention forward (Pallas-backed)
# ----------------------------------------------------------------------------
def multihead_attention_forward(query, key, value, params, num_heads):
    """query: (L, N, E); key/value: (S, N, E).
    Returns (attn_output (L, N, E), attn_output_weights (N, L, S))."""
    # TODO(synk): key_padding_mask / attn_mask / dropout / bias_kv / zero_attn
    # are not implemented (the module's defaults leave them disabled).
    L, N, E = query.shape
    S = key.shape[0]
    H = num_heads
    Dh = E // H
    scale = 1.0 / math.sqrt(Dh)

    in_w = params["in_proj_weight"]      # (3E, E)
    in_b = params["in_proj_bias"]        # (3E,)
    out_w = params["out_proj_weight"]    # (E, E)
    out_b = params["out_proj_bias"]      # (E,)

    # Fold the 1/sqrt(Dh) softmax scale into the q-projection parameters
    # (one tiny weight transform instead of a per-element VPU pass on q).
    w_q = in_w[:E] * scale
    b_q = in_b[:E] * scale

    if query is key and key is value:
        # Self-attention: one fused (3E) in-projection, batch-first layout,
        # bf16 intermediate (it is consumed in bf16 by the MXU anyway).
        x = jnp.transpose(query, (1, 0, 2)).reshape(N * L, E)
        w_in = jnp.concatenate([w_q, in_w[E:]], axis=0)
        b_in = jnp.concatenate([b_q, in_b[E:]], axis=0)
        qkv = pallas_linear(x, w_in, b_in,
                            out_dtype=MXU_DTYPE).reshape(N, L, 3 * E)
        o_nle, attn_weights = pallas_self_attention(
            qkv, out_w, out_b, H, out_dtype=query.dtype)
    else:
        xq = jnp.transpose(query, (1, 0, 2)).reshape(N * L, E)
        xk = jnp.transpose(key, (1, 0, 2)).reshape(N * S, E)
        xv = jnp.transpose(value, (1, 0, 2)).reshape(N * S, E)
        q = pallas_linear(xq, w_q, b_q,
                          out_dtype=MXU_DTYPE).reshape(N, L, E)
        k = pallas_linear(xk, in_w[E:2 * E], in_b[E:2 * E],
                          out_dtype=MXU_DTYPE).reshape(N, S, E)
        v = pallas_linear(xv, in_w[2 * E:], in_b[2 * E:],
                          out_dtype=MXU_DTYPE).reshape(N, S, E)
        o_nle, attn_weights = pallas_cross_attention(
            q, k, v, out_w, out_b, H, out_dtype=query.dtype)

    # Out-projection is fused into the attention kernel; only the final
    # (L, N, E) layout change remains here.
    attn_out = jnp.transpose(o_nle, (1, 0, 2))                  # (L, N, E)
    return attn_out, attn_weights


# ----------------------------------------------------------------------------
# Deterministic parameter init (mirrors _reset_parameters)
# ----------------------------------------------------------------------------
def init_params(key, embed_dim):
    E = embed_dim
    k1, k2 = jax.random.split(key)
    bound_in = math.sqrt(6.0 / (E + 3 * E))          # xavier_uniform_
    in_proj_weight = jax.random.uniform(k1, (3 * E, E), jnp.float32,
                                        -bound_in, bound_in)
    in_proj_bias = jnp.zeros((3 * E,), jnp.float32)
    bound_out = math.sqrt(6.0 / (E + E))
    out_proj_weight = jax.random.uniform(k2, (E, E), jnp.float32,
                                         -bound_out, bound_out)
    out_proj_bias = jnp.zeros((E,), jnp.float32)
    return {
        "in_proj_weight": in_proj_weight,
        "in_proj_bias": in_proj_bias,
        "out_proj_weight": out_proj_weight,
        "out_proj_bias": out_proj_bias,
    }


# ----------------------------------------------------------------------------
# Pure-JAX f32 reference (same math) for correctness check
# ----------------------------------------------------------------------------
def _reference(query, key, value, params, num_heads):
    L, N, E = query.shape
    S = key.shape[0]
    H, Dh = num_heads, E // num_heads
    scale = 1.0 / math.sqrt(Dh)
    in_w, in_b = params["in_proj_weight"], params["in_proj_bias"]
    q = query @ in_w[:E].T + in_b[:E]
    k = key @ in_w[E:2 * E].T + in_b[E:2 * E]
    v = value @ in_w[2 * E:].T + in_b[2 * E:]
    q = q.reshape(L, N, H, Dh).transpose(1, 2, 0, 3) * scale
    k = k.reshape(S, N, H, Dh).transpose(1, 2, 0, 3)
    v = v.reshape(S, N, H, Dh).transpose(1, 2, 0, 3)
    s = jnp.einsum("nhld,nhsd->nhls", q, k)
    p = jax.nn.softmax(s, axis=-1)
    o = jnp.einsum("nhls,nhsd->nhld", p, v)
    attn = o.transpose(2, 0, 1, 3).reshape(L, N, E)
    out = attn @ params["out_proj_weight"].T + params["out_proj_bias"]
    return out, jnp.sum(p, axis=1) / H


if __name__ == "__main__":
    L, S, N, E, H = 8, 16, 2, 32, 4
    # bf16 MXU inputs (f32 accumulation) -> loosen tolerance vs. f32 reference.
    ATOL = RTOL = 2e-2

    key0 = jax.random.PRNGKey(0)
    kq, kk, kv, kp = jax.random.split(key0, 4)
    params = init_params(kp, E)

    # --- self-attention path (fused QKV in-projection + fused out-proj) ---
    x = jax.random.normal(kq, (L, N, E), jnp.float32)
    out_s, w_s = multihead_attention_forward(x, x, x, params, H)
    jax.block_until_ready((out_s, w_s))
    ref_out_s, ref_w_s = _reference(x, x, x, params, H)
    assert out_s.shape == (L, N, E) and w_s.shape == (N, L, L)
    assert jnp.allclose(out_s, ref_out_s, atol=ATOL, rtol=RTOL)
    assert jnp.allclose(w_s, ref_w_s, atol=ATOL, rtol=RTOL)

    # --- cross-attention path (separate projections, L != S) ---
    query = jax.random.normal(kq, (L, N, E), jnp.float32)
    key_in = jax.random.normal(kk, (S, N, E), jnp.float32)
    value = jax.random.normal(kv, (S, N, E), jnp.float32)
    out_c, w_c = multihead_attention_forward(query, key_in, value, params, H)
    jax.block_until_ready((out_c, w_c))
    ref_out_c, ref_w_c = _reference(query, key_in, value, params, H)
    assert out_c.shape == (L, N, E) and w_c.shape == (N, L, S)
    assert jnp.allclose(out_c, ref_out_c, atol=ATOL, rtol=RTOL)
    assert jnp.allclose(w_c, ref_w_c, atol=ATOL, rtol=RTOL)

    print("KERNEL_OK")
</pallas_src>

<mosaic_0001>
module attributes {stable_mosaic.version = 11 : i64} {
  func.func @_linear_kernel(%arg0: i32, %arg1: i32, %arg2: i32, %arg3: memref<16x32xf32, #tpu.memory_space<vmem>>, %arg4: memref<96x32xf32, #tpu.memory_space<vmem>>, %arg5: memref<1x96xf32, #tpu.memory_space<vmem>>, %arg6: memref<16x96xbf16, #tpu.memory_space<vmem>>, %arg7: memref<16x96xf32, #tpu.memory_space<vmem>>) attributes {dimension_semantics = [#tpu.dimension_semantics<parallel>, #tpu.dimension_semantics<parallel>, #tpu.dimension_semantics<arbitrary>], iteration_bounds = array<i64: 1, 1, 1>, scalar_prefetch = 0 : i64, scratch_operands = 1 : i64, tpu.core_type = #tpu.core_type<tc>, window_params = [{transform_indices = @transform_0, window_bounds = array<i64: 16, 32>}, {transform_indices = @transform_1, window_bounds = array<i64: 96, 32>}, {transform_indices = @transform_2, window_bounds = array<i64: 1, 96>}, {transform_indices = @transform_3, window_bounds = array<i64: 16, 96>}]} {
    %c0_i32 = arith.constant 0 : i32
    %0 = arith.cmpi eq, %arg2, %c0_i32 : i32
    %1 = arith.extui %0 : i1 to i32
    %c0_i32_0 = arith.constant 0 : i32
    %2 = arith.cmpi ne, %1, %c0_i32_0 : i32
    scf.if %2 {
      %cst_10 = arith.constant 0.000000e+00 : f32
      %14 = vector.broadcast %cst_10 : f32 to vector<16x96xf32>
      %c0_11 = arith.constant 0 : index
      %c0_12 = arith.constant 0 : index
      %15 = vector.load %arg7[%c0_11, %c0_12] : memref<16x96xf32, #tpu.memory_space<vmem>>, vector<16x96xf32>
      tpu.vector_store %arg7[%c0_11, %c0_12], %14 {strides = array<i32>} : memref<16x96xf32, #tpu.memory_space<vmem>>, vector<16x96xf32>,
    } else {
    }
    %c0 = arith.constant 0 : index
    %c0_1 = arith.constant 0 : index
    %3 = vector.load %arg7[%c0, %c0_1] : memref<16x96xf32, #tpu.memory_space<vmem>>, vector<16x96xf32>
    %c0_2 = arith.constant 0 : index
    %c0_3 = arith.constant 0 : index
    %4 = vector.load %arg3[%c0_2, %c0_3] : memref<16x32xf32, #tpu.memory_space<vmem>>, vector<16x32xf32>
    %5 = arith.truncf %4 : vector<16x32xf32> to vector<16x32xbf16>
    %c0_4 = arith.constant 0 : index
    %c0_5 = arith.constant 0 : index
    %6 = vector.load %arg4[%c0_4, %c0_5] : memref<96x32xf32, #tpu.memory_space<vmem>>, vector<96x32xf32>
    %7 = arith.truncf %6 : vector<96x32xf32> to vector<96x32xbf16>
    %cst = arith.constant dense<0.000000e+00> : vector<16x96xf32>
    %8 = tpu.matmul %5, %7, %cst {dimension_numbers = #tpu.dot_dimension_numbers<[1], [1], [0], [0], [0, 0, 1, 0], [], []>} : vector<16x32xbf16>, vector<96x32xbf16>, vector<16x96xf32> -> vector<16x96xf32>
    %9 = arith.addf %3, %8 : vector<16x96xf32>
    %c0_6 = arith.constant 0 : index
    %c0_7 = arith.constant 0 : index
    %10 = vector.load %arg7[%c0_6, %c0_7] : memref<16x96xf32, #tpu.memory_space<vmem>>, vector<16x96xf32>
    tpu.vector_store %arg7[%c0_6, %c0_7], %9 {strides = array<i32>} : memref<16x96xf32, #tpu.memory_space<vmem>>, vector<16x96xf32>,
    %c0_i32_8 = arith.constant 0 : i32
    %11 = arith.cmpi eq, %arg2, %c0_i32_8 : i32
    %12 = arith.extui %11 : i1 to i32
    %c0_i32_9 = arith.constant 0 : i32
    %13 = arith.cmpi ne, %12, %c0_i32_9 : i32
    scf.if %13 {
      %c0_10 = arith.constant 0 : index
      %c0_11 = arith.constant 0 : index
      %14 = vector.load %arg7[%c0_10, %c0_11] : memref<16x96xf32, #tpu.memory_space<vmem>>, vector<16x96xf32>
      %c0_12 = arith.constant 0 : index
      %c0_13 = arith.constant 0 : index
      %15 = vector.load %arg5[%c0_12, %c0_13] : memref<1x96xf32, #tpu.memory_space<vmem>>, vector<1x96xf32>
      %16 = vector.broadcast %15 : vector<1x96xf32> to vector<16x96xf32>
      %17 = arith.addf %14, %16 : vector<16x96xf32>
      %18 = arith.truncf %17 : vector<16x96xf32> to vector<16x96xbf16>
      %c0_14 = arith.constant 0 : index
      %c0_15 = arith.constant 0 : index
      %19 = vector.load %arg6[%c0_14, %c0_15] : memref<16x96xbf16, #tpu.memory_space<vmem>>, vector<16x96xbf16>
      tpu.vector_store %arg6[%c0_14, %c0_15], %18 {strides = array<i32>} : memref<16x96xbf16, #tpu.memory_space<vmem>>, vector<16x96xbf16>,
    } else {
    }
    return
  }
  func.func @transform_0(%arg0: i32, %arg1: i32, %arg2: i32) -> (i32, i32) {
    %c0_i32 = arith.constant 0 : i32
    return %arg0, %arg2 : i32, i32
  }
  func.func @transform_1(%arg0: i32, %arg1: i32, %arg2: i32) -> (i32, i32) {
    %c0_i32 = arith.constant 0 : i32
    return %arg1, %arg2 : i32, i32
  }
  func.func @transform_2(%arg0: i32, %arg1: i32, %arg2: i32) -> (i32, i32) {
    %c0_i32 = arith.constant 0 : i32
    %c0_i32_0 = arith.constant 0 : i32
    return %c0_i32, %arg1 : i32, i32
  }
  func.func @transform_3(%arg0: i32, %arg1: i32, %arg2: i32) -> (i32, i32) {
    %c0_i32 = arith.constant 0 : i32
    return %arg0, %arg1 : i32, i32
  }
}

</mosaic_0001>

<bundles_post_ra>
// kernel: tpu_custom_call.1
= control target key start
LH: loop header
LB: loop body
LE: loop exit
PB: predicated region body
PF: predicated region fallthrough
CT: control target
= control target key end

     0   :  { %vm46_vm0 = vcmask 261120   ;;  %v211_v2 = vmov 0.0   ;;  %vm212_vm1 = vmmov 0   ;;  %vm20_vm2 = vcmask 785408   ;;  %s295_s0 = inlined_call_operand.vmem [shape: f32[16,32], index: 0, kind: input, shape index: {}]   ;;  %s296_s1 = inlined_call_operand.vmem [shape: f32[96,32], index: 1, kind: input, shape index: {}]   ;;  %s297_s2 = inlined_call_operand.vmem [shape: f32[1,96], index: 2, kind: input, shape index: {}]   ;;  %s298_s3 = inlined_call_operand.hbm [shape: bf16[16,96], index: 3, kind: output, shape index: {}]  }
   0x1   :  { %v38_v0 = vld [vmem:[%s296_s1 + $0x50] sm:$0xff]  ;;  %v39_v1 = vld [vmem:[%s296_s1 + $0x58] sm:$0xff]  ;;  %168 = vmatprep.subr.bf16.mxu0 %v211_v2  ;;  %180 = vmatprep.mubr.msk.bf16.mxu0 %vm212_vm1, %v211_v2  ;;  %v36_v4 = vld [vmem:[%s296_s1 + $0x40] sm:$0xff]  ;;  %21 = vst.msk [vmem:[#allocation2] sm:$0xff] %vm20_vm2, %v211_v2 }
   0x2   :  { %v45_v3 = vpack.c.bf16 %v39_v1, %v38_v0  ;;  %v37_v5 = vld [vmem:[%s296_s1 + $0x48] sm:$0xff]  ;;  %22 = vst.msk [vmem:[#allocation2 + $0x8] sm:$0xff] %vm20_vm2, %v211_v2 }
   0x4   :  { %v66_v6 = vsel %vm46_vm0, %v45_v3, 0 }
   0x5   :  { %169 = vmatpush3.bf16.xpose.msra.mxu0 %v66_v6 }
   0x6   :  { %8 = vsyncpa [#allocation4], 0  ;;  %170 = vmatprep.subr.bf16.mxu0 %v211_v2  ;;  %v44_v7 = vpack.c.bf16 %v37_v5, %v36_v4  ;;  %v34_v9 = vld [vmem:[%s296_s1 + $0x30] sm:$0xff]  ;;  %v35_v10 = vld [vmem:[%s296_s1 + $0x38] sm:$0xff]  ;;  %vm136_vm3 = vcmask 781312  }
   0x7   :  { %v43_v11 = vpack.c.bf16 %v35_v10, %v34_v9  ;;  %v32_v13 = vld [vmem:[%s296_s1 + $0x20] sm:$0xff]  ;;  %v33_v14 = vld [vmem:[%s296_s1 + $0x28] sm:$0xff]  ;;  %v30_v17 = vld [vmem:[%s296_s1 + $0x10] sm:$0xff] }
   0x8   :  { %v63_v8 = vsel %vm46_vm0, %v44_v7, 0  ;;  %v42_v15 = vpack.c.bf16 %v33_v14, %v32_v13  ;;  %v31_v18 = vld [vmem:[%s296_s1 + $0x18] sm:$0xff]  ;;  %v28_v21 = vld [vmem:[%s296_s1] sm:$0xff]  ;;  %v29_v22 = vld [vmem:[%s296_s1 + $0x8] sm:$0xff] }
   0x9   :  { %v60_v12 = vsel %vm46_vm0, %v43_v11, 0  ;;  %v41_v19 = vpack.c.bf16 %v31_v18, %v30_v17  ;;  %v40_v23 = vpack.c.bf16 %v29_v22, %v28_v21  ;;  %v25_v25 = vld [vmem:[%s295_s0] sm:$0xff]  ;;  %v26_v26 = vld [vmem:[%s295_s0 + $0x8] sm:$0xff]  ;;  %s213_s0 = smov [#allocation3]  }
   0xa   :  { %v57_v16 = vsel %vm46_vm0, %v42_v15, 0  ;;  %v27_v27 = vpack.c.bf16 %v26_v26, %v25_v25  ;;  %v23_v28 = vld [vmem:[#allocation2] sm:$0xff]  ;;  %v24_v32 = vld [vmem:[#allocation2 + $0x8] sm:$0xff]  ;;  %s144_s14 = sshll.u32 %s213_s0, 4  ;;  %s145_s14 = int_to_ptr.vmem [resolvable:$true] %s144_s14 }
   0xb   :  { %v54_v20 = vsel %vm46_vm0, %v41_v19, 0  ;;  %v51_v24 = vsel %vm46_vm0, %v40_v23, 0  ;;  %v156_v36 = vld [vmem:[%s297_s2] ss:$0 sm:$0xff]  ;;  %s189_s15 = scalar_lea.vmem %s145_s14, 128  ;;  %p194_p1 = scmp.lt.s32.totalorder %s145_s14, %s145_s14 }
   0xc   :  { %p190_p0 = scmp.ne.s32.totalorder %s145_s14, %s189_s15  ;;  %p195_p2 = scmp.lt.s32.totalorder %s189_s15, %s189_s15 }
   0xd   :  { %171 = vmatpush3.bf16.xpose.msra.mxu0 %v63_v8 }
   0xe   :  { %172 = vmatprep.subr.bf16.mxu0 %v211_v2  ;;  %p196_p3 = por %p195_p2, %p194_p1 }
  0x10   :  { %p197_p4 = pnand %p196_p3, %p190_p0 }
  0x15   :  { %173 = vmatpush3.bf16.xpose.msra.mxu0 %v60_v12 }
  0x16   :  { %174 = vmatprep.subr.bf16.mxu0 %v211_v2 }
  0x1d   :  { %175 = vmatpush3.bf16.xpose.msra.mxu0 %v57_v16 }
  0x1e   :  { %176 = vmatprep.subr.bf16.mxu0 %v211_v2 }
  0x25   :  { %177 = vmatpush3.bf16.xpose.msra.mxu0 %v54_v20 }
  0x26   :  { %178 = vmatprep.subr.bf16.mxu0 %v211_v2 }
  0x2d   :  { %179 = vmatpush3.bf16.xpose.msra.mxu0 %v51_v24 }
  0x34   :  { %181 = vmatmul.mubr.msk.bf16.vlgmr.msra.gmra.mxu0 %vm46_vm0, %v27_v27 }
  0xf4   :  { %v102_v29 = vpop.f32.mrf.mxu0 }
  0xf5   :  { %v109_v30 = vadd.f32 %v102_v29, %v23_v28 }
  0xf6   :  { %v182_v31 = vpop.f32.mrf.mxu0 }
  0xf7   :  { %112 = vst.msk [vmem:[#allocation2] sm:$0xff] %vm20_vm2, %v109_v30 }
  0xf8   :  { %v105_v33 = vpop.f32.mrf.mxu0 }
  0xf9   :  { %v110_v34 = vadd.f32 %v105_v33, %v24_v32 }
  0xfa   :  { %v183_v35 = vpop.f32.mrf.mxu0 }
  0xfb   :  { %113 = vst.msk [vmem:[#allocation2 + $0x8] sm:$0xff] %vm20_vm2, %v110_v34 }
  0xfe   :  { %v117_v37 = vld [vmem:[#allocation2] sm:$0xff] }
  0xff   :  { %v126_v38 = vadd.f32 %v156_v36, %v117_v37 }
 0x101   :  { %v159_v39 = vpack.c.bf16 %v126_v38, %v126_v38 }
 0x102   :  { %v118_v40 = vld [vmem:[#allocation2 + $0x8] sm:$0xff] }
 0x103   :  { %v127_v41 = vadd.f32 %v156_v36, %v118_v40  ;;  %137 = vst.msk [vmem:[#allocation3] sm:$0xf] %vm136_vm3, %v159_v39 }
 0x105   :  { %v160_v42 = vpack.c.bf16 %v127_v41, %v127_v41 }
 0x107   :  { %138 = vst.msk [vmem:[#allocation3 + $0x4] sm:$0xf] %vm136_vm3, %v160_v42 }
 0x108   :  { %200 = shalt.err (!%p197_p4)
}
 0x109   :  { %s214_s2 = smov 64   ;;  %s215_s16 = smov 4  }
 0x10a   :  { %150 = dma.vmem_to_hbm [thread:$0]  %s145_s14, 128, %s298_s3, [#allocation4], %s214_s2, %s214_s2, %s215_s16  }
 0x10b   :  { %209 = dma.done.wait [#allocation4], 128  }
 0x10c   :  { %210 = vsyncadd [#allocation4], 4294967168 }
 0x10d   :  { %154 = vsyncpa [#allocation4], 1 }

</bundles_post_ra>
